<compile_context>
chip_gen: v5e
topology: v5e:2x2
jax: 0.10.0
libtpu: 0.0.40
codegen_flags: <defaults>
</compile_context>

<pallas_src>
import functools

import jax
import jax.numpy as jnp
from jax.experimental import pallas as pl
from jax.experimental.pallas import tpu as pltpu


def _round_up(x, m):
    return ((x + m - 1) // m) * m


def _conv1d_kernel(x_cur_ref, x_halo_ref, w_ref, b_ref, o_ref, lhs_ref, *,
                   K, stride, dilation, c_in, c_stride, tile_t):
    """One (cout-tile, batch, time-tile) grid step.

    x_cur_ref : (tile_t, stride*C_in)   super-rows [ti*tile_t, (ti+1)*tile_t)
    x_halo_ref: (halo_pad, stride*C_in) super-rows right after the tile
    w_ref     : (K*c_stride, tile_n)    taps stacked along the contraction dim
    b_ref     : (1, tile_n)             bias (f32)
    o_ref     : (tile_t, tile_n)        output tile
    lhs_ref   : (tile_t, K*c_stride)    lane-aligned im2col scratch
    """
    # Assemble the im2col LHS.  All offsets/sizes are static Python ints, so
    # this short loop is fully unrolled at trace time.
    for kk in range(K):
        d = kk * dilation
        qoff = d // stride          # super-row offset of this tap
        s = d % stride              # phase inside a super-row
        col = kk * c_stride         # 128-lane-aligned destination column
        src_col = s * c_in
        n_cur = tile_t - qoff       # rows of this tap inside the main block
        n_halo = qoff               # rows spilling into the halo block
        if n_cur > 0:
            lhs_ref[0:n_cur, col:col + c_in] = (
                x_cur_ref[qoff:qoff + n_cur, src_col:src_col + c_in])
        if n_halo > 0:
            lhs_ref[n_cur:tile_t, col:col + c_in] = (
                x_halo_ref[0:n_halo, src_col:src_col + c_in])
        if c_stride > c_in:
            # Zero the padding lanes so garbage (possibly NaN) never reaches
            # the MXU.  Statically skipped when C_in is already 128-aligned.
            lhs_ref[:, col + c_in:col + c_stride] = jnp.zeros(
                (tile_t, c_stride - c_in), lhs_ref.dtype)

    # Single fused MXU contraction over K*c_stride, f32 accumulation.
    acc = jnp.dot(lhs_ref[...], w_ref[...], preferred_element_type=jnp.float32)
    acc = acc + b_ref[...].astype(jnp.float32)          # (1, tile_n) broadcast
    o_ref[...] = acc.astype(o_ref.dtype)


def conv_forward(x, weight, bias=None, *, stride=1, padding=0, dilation=1,
                 compute_dtype=None, max_tile_t=512):
    """Equivalent of Conv.forward.

    x      : (B, T, C_in)
    weight : (C_out, C_in, K)   (PyTorch Conv1d weight layout)
    bias   : (C_out,) or None
    returns: (B, T_out, C_out)
    """
    B, T, C_in = x.shape
    C_out, C_in_w, K = weight.shape
    assert C_in == C_in_w
    assert stride >= 1 and dilation >= 1 and padding >= 0
    t_out = (T + 2 * padding - dilation * (K - 1) - 1) // stride + 1
    assert t_out > 0

    cdt = jnp.dtype(compute_dtype) if compute_dtype is not None else jnp.dtype(x.dtype)
    out_dtype = x.dtype
    itemsize = cdt.itemsize

    # --- lane-aligned layout constants ------------------------------------
    c_stride = _round_up(C_in, 128)       # per-tap lane stride in the scratch
    C_out_pad = _round_up(C_out, 128)     # lane-dense output
    C_g = stride * C_in                   # channels per "super-row" (stride folded into DMA)

    # Weight tiling: keep the whole C_out resident when it fits comfortably.
    w_bytes = K * c_stride * C_out_pad * itemsize
    if w_bytes <= 8 * 1024 * 1024 or C_out_pad <= 512:
        tile_n = C_out_pad
    elif C_out_pad % 256 == 0:
        tile_n = 256
    else:
        tile_n = 128
    n_ct = C_out_pad // tile_n

    # Halo in super-row units, kept minimal; tile_t is a multiple of halo_pad
    # so the halo block index is expressible with Blocked semantics.
    q_off_max = (dilation * (K - 1)) // stride
    halo_pad = max(8, _round_up(q_off_max, 8))

    tile_t = min(max_tile_t, _round_up(t_out, 8))
    tile_t = _round_up(tile_t, halo_pad)

    # Per-generation VMEM budget (~75% of physical per-core VMEM).
    try:
        vmem_cap = int(pltpu.get_tpu_info().vmem_capacity_bytes)
    except Exception:
        vmem_cap = 64 * 1024 * 1024
    vmem_limit = max(32 * 1024 * 1024, min(int(vmem_cap * 0.75), 100 * 1024 * 1024))

    def _footprint(tt):
        x_blk = (tt + halo_pad) * C_g * itemsize
        w_blk = K * c_stride * tile_n * itemsize + tile_n * 4
        o_blk = tt * tile_n * jnp.dtype(out_dtype).itemsize
        scratch = tt * K * c_stride * itemsize
        return 2 * (x_blk + w_blk + o_blk) + scratch       # double-buffered

    while _footprint(tile_t) > 0.8 * vmem_limit and tile_t > halo_pad:
        tile_t = max(halo_pad, _round_up(tile_t // 2, halo_pad))

    nt = pl.cdiv(t_out, tile_t)
    # v7x has 2 TensorCores: guarantee >= 2 parallel grid steps when possible.
    if B * nt * n_ct == 1 and t_out > halo_pad:
        tile_t = _round_up(pl.cdiv(t_out, 2), halo_pad)
        nt = pl.cdiv(t_out, tile_t)
    halo_step = tile_t // halo_pad

    # --- wrapper-side glue (pure JAX) --------------------------------------
    # TODO(synk): cache the weight/bias relayout at parameter-load time instead
    # of redoing it on every forward call.
    T_q = nt * tile_t + halo_pad                  # super-rows allocated
    L = T_q * stride                              # padded input rows needed
    x_pad = jnp.pad(x, ((0, 0), (padding, max(0, L - padding - T)), (0, 0)))
    x_pad = x_pad[:, :L, :]
    x_q = x_pad.reshape(B, T_q, C_g).astype(cdt)

    w_t = jnp.transpose(weight, (2, 1, 0))                        # (K, C_in, C_out)
    w_t = jnp.pad(w_t, ((0, 0), (0, c_stride - C_in), (0, C_out_pad - C_out)))
    w2 = w_t.reshape(K * c_stride, C_out_pad).astype(cdt)
    if bias is None:
        b2 = jnp.zeros((1, C_out_pad), jnp.float32)
    else:
        b2 = jnp.pad(bias.astype(jnp.float32),
                     (0, C_out_pad - C_out)).reshape(1, C_out_pad)

    kernel = functools.partial(_conv1d_kernel, K=K, stride=stride,
                               dilation=dilation, c_in=C_in,
                               c_stride=c_stride, tile_t=tile_t)

    cost = pl.CostEstimate(
        flops=2 * B * t_out * K * C_in * C_out,
        transcendentals=0,
        bytes_accessed=(n_ct * x_q.size * x_q.dtype.itemsize      # input streamed per C_out tile
                        + w2.size * w2.dtype.itemsize             # weights resident per tile
                        + B * t_out * C_out_pad * jnp.dtype(out_dtype).itemsize),
    )

    out = pl.pallas_call(
        kernel,
        out_shape=jax.ShapeDtypeStruct((B, t_out, C_out_pad), out_dtype),
        grid=(n_ct, B, nt),          # C_out tile slowest -> weight tile stays VMEM-resident
        in_specs=[
            # main input tile (super-rows)
            pl.BlockSpec((pl.Squeezed(), tile_t, C_g),
                         lambda ni, b, ti: (b, ti, 0)),
            # halo: rows immediately after the tile (block index multiple of the tile)
            pl.BlockSpec((pl.Squeezed(), halo_pad, C_g),
                         lambda ni, b, ti: (b, (ti + 1) * halo_step, 0)),
            # weights reshaped to (K*c_stride, C_out_pad), tiled over C_out
            pl.BlockSpec((K * c_stride, tile_n), lambda ni, b, ti: (0, ni)),
            # bias
            pl.BlockSpec((1, tile_n), lambda ni, b, ti: (0, ni)),
        ],
        out_specs=pl.BlockSpec((pl.Squeezed(), tile_t, tile_n),
                               lambda ni, b, ti: (b, ti, ni)),
        scratch_shapes=[pltpu.VMEM((tile_t, K * c_stride), cdt)],
        compiler_params=pltpu.CompilerParams(
            dimension_semantics=("parallel", "parallel", "parallel"),
            vmem_limit_bytes=vmem_limit,
        ),
        cost_estimate=cost,
    )(x_q, x_q, w2, b2)              # x_q passed twice: main tile + halo view

    if C_out_pad != C_out:
        out = out[..., :C_out]
    return out


def _reference(x, weight, bias, *, stride, padding, dilation):
    # Pure-JAX reference reproducing the PyTorch module exactly.
    x_nch = jnp.transpose(x, (0, 2, 1))
    y = jax.lax.conv_general_dilated(
        x_nch, weight,
        window_strides=(stride,),
        padding=[(padding, padding)],
        rhs_dilation=(dilation,),
        dimension_numbers=("NCH", "OIH", "NCH"),
    ) + bias[None, :, None]
    return jnp.transpose(y, (0, 2, 1))


def _run_case(key, B, T, C_in, C_out, K, stride, padding, dilation,
              compute_dtype=None, max_tile_t=512, tol=2e-4):
    kx, kw, kb = jax.random.split(key, 3)
    x = jax.random.normal(kx, (B, T, C_in), dtype=jnp.float32)
    fan_in, fan_out = C_in * K, C_out * K
    limit = (6.0 / (fan_in + fan_out)) ** 0.5
    weight = jax.random.uniform(kw, (C_out, C_in, K), jnp.float32, -limit, limit)
    bias = jax.random.uniform(kb, (C_out,), jnp.float32, -0.1, 0.1)

    out = conv_forward(x, weight, bias, stride=stride, padding=padding,
                       dilation=dilation, compute_dtype=compute_dtype,
                       max_tile_t=max_tile_t)
    out = jax.block_until_ready(out)
    ref = _reference(x, weight, bias, stride=stride, padding=padding,
                     dilation=dilation)
    assert out.shape == ref.shape, (out.shape, ref.shape)
    err = float(jnp.max(jnp.abs(out.astype(jnp.float32) - ref)))
    assert jnp.allclose(out.astype(jnp.float32), ref, atol=tol, rtol=tol), (
        f"mismatch vs reference (max abs err {err})")


if __name__ == "__main__":
    key = jax.random.PRNGKey(0)
    keys = jax.random.split(key, 6)

    # Typical JETS usage of Conv: kernel_size=3, padding=1 (small smoke shapes).
    _run_case(keys[0], B=2, T=16, C_in=8, C_out=16, K=3, stride=1, padding=1, dilation=1)
    # Pointwise conv (the module's default kernel_size=1).
    _run_case(keys[1], B=2, T=16, C_in=8, C_out=16, K=1, stride=1, padding=0, dilation=1)
    # Dilated conv across multiple time tiles (halo straddles tile boundaries).
    _run_case(keys[2], B=1, T=24, C_in=16, C_out=32, K=3, stride=1, padding=2, dilation=2)
    # Strided conv (stride decimation folded into the DMA layout).
    _run_case(keys[3], B=1, T=50, C_in=8, C_out=16, K=3, stride=2, padding=1, dilation=1)
    # Lane-aligned channels, several time tiles with a partial last tile.
    _run_case(keys[4], B=2, T=72, C_in=128, C_out=256, K=3, stride=1, padding=1,
              dilation=1, max_tile_t=32)
    # bf16 MXU operands (f32 accumulation), looser tolerance.
    _run_case(keys[5], B=2, T=40, C_in=128, C_out=128, K=3, stride=1, padding=1,
              dilation=1, compute_dtype=jnp.bfloat16, tol=5e-2)

    print("KERNEL_OK")
</pallas_src>

<mosaic_0001>
module attributes {stable_mosaic.version = 11 : i64} {
  func.func @_conv1d_kernel(%arg0: i32, %arg1: i32, %arg2: i32, %arg3: memref<1x16x8xf32, #tpu.memory_space<vmem>>, %arg4: memref<1x8x8xf32, #tpu.memory_space<vmem>>, %arg5: memref<384x128xf32, #tpu.memory_space<vmem>>, %arg6: memref<1x128xf32, #tpu.memory_space<vmem>>, %arg7: memref<1x16x128xf32, #tpu.memory_space<vmem>>, %arg8: memref<16x384xf32, #tpu.memory_space<vmem>>) attributes {dimension_semantics = [#tpu.dimension_semantics<parallel>, #tpu.dimension_semantics<parallel>, #tpu.dimension_semantics<parallel>], iteration_bounds = array<i64: 1, 2, 1>, scalar_prefetch = 0 : i64, scratch_operands = 1 : i64, tpu.core_type = #tpu.core_type<tc>, window_params = [{transform_indices = @transform_0, window_bounds = array<i64: 1, 16, 8>}, {transform_indices = @transform_1, window_bounds = array<i64: 1, 8, 8>}, {transform_indices = @transform_2, window_bounds = array<i64: 384, 128>}, {transform_indices = @transform_3, window_bounds = array<i64: 1, 128>}, {transform_indices = @transform_4, window_bounds = array<i64: 1, 16, 128>}]} {
    %c0 = arith.constant 0 : index
    %c0_0 = arith.constant 0 : index
    %c0_1 = arith.constant 0 : index
    %0 = vector.load %arg3[%c0, %c0_0, %c0_1] : memref<1x16x8xf32, #tpu.memory_space<vmem>>, vector<1x16x8xf32>
    %1 = vector.shape_cast %0 : vector<1x16x8xf32> to vector<16x8xf32>
    %c0_2 = arith.constant 0 : index
    %c0_3 = arith.constant 0 : index
    %2 = vector.load %arg8[%c0_2, %c0_3] : memref<16x384xf32, #tpu.memory_space<vmem>>, vector<16x8xf32>
    tpu.vector_store %arg8[%c0_2, %c0_3], %1 {strides = array<i32>} : memref<16x384xf32, #tpu.memory_space<vmem>>, vector<16x8xf32>,
    %cst = arith.constant 0.000000e+00 : f32
    %3 = vector.broadcast %cst : f32 to vector<16x120xf32>
    %c0_4 = arith.constant 0 : index
    %c8 = arith.constant 8 : index
    %4 = vector.load %arg8[%c0_4, %c8] : memref<16x384xf32, #tpu.memory_space<vmem>>, vector<16x120xf32>
    tpu.vector_store %arg8[%c0_4, %c8], %3 {strides = array<i32>} : memref<16x384xf32, #tpu.memory_space<vmem>>, vector<16x120xf32>,
    %c0_5 = arith.constant 0 : index
    %c1 = arith.constant 1 : index
    %c0_6 = arith.constant 0 : index
    %5 = vector.load %arg3[%c0_5, %c1, %c0_6] : memref<1x16x8xf32, #tpu.memory_space<vmem>>, vector<1x15x8xf32>
    %6 = vector.shape_cast %5 : vector<1x15x8xf32> to vector<15x8xf32>
    %c0_7 = arith.constant 0 : index
    %c128 = arith.constant 128 : index
    %7 = vector.load %arg8[%c0_7, %c128] : memref<16x384xf32, #tpu.memory_space<vmem>>, vector<15x8xf32>
    tpu.vector_store %arg8[%c0_7, %c128], %6 {strides = array<i32>} : memref<16x384xf32, #tpu.memory_space<vmem>>, vector<15x8xf32>,
    %c0_8 = arith.constant 0 : index
    %c0_9 = arith.constant 0 : index
    %c0_10 = arith.constant 0 : index
    %8 = vector.load %arg4[%c0_8, %c0_9, %c0_10] : memref<1x8x8xf32, #tpu.memory_space<vmem>>, vector<1x1x8xf32>
    %9 = vector.shape_cast %8 : vector<1x1x8xf32> to vector<1x8xf32>
    %c15 = arith.constant 15 : index
    %c128_11 = arith.constant 128 : index
    %10 = vector.load %arg8[%c15, %c128_11] : memref<16x384xf32, #tpu.memory_space<vmem>>, vector<1x8xf32>
    tpu.vector_store %arg8[%c15, %c128_11], %9 {strides = array<i32>} : memref<16x384xf32, #tpu.memory_space<vmem>>, vector<1x8xf32>,
    %cst_12 = arith.constant 0.000000e+00 : f32
    %11 = vector.broadcast %cst_12 : f32 to vector<16x120xf32>
    %c0_13 = arith.constant 0 : index
    %c136 = arith.constant 136 : index
    %12 = vector.load %arg8[%c0_13, %c136] : memref<16x384xf32, #tpu.memory_space<vmem>>, vector<16x120xf32>
    tpu.vector_store %arg8[%c0_13, %c136], %11 {strides = array<i32>} : memref<16x384xf32, #tpu.memory_space<vmem>>, vector<16x120xf32>,
    %c0_14 = arith.constant 0 : index
    %c2 = arith.constant 2 : index
    %c0_15 = arith.constant 0 : index
    %13 = vector.load %arg3[%c0_14, %c2, %c0_15] : memref<1x16x8xf32, #tpu.memory_space<vmem>>, vector<1x14x8xf32>
    %14 = vector.shape_cast %13 : vector<1x14x8xf32> to vector<14x8xf32>
    %c0_16 = arith.constant 0 : index
    %c256 = arith.constant 256 : index
    %15 = vector.load %arg8[%c0_16, %c256] : memref<16x384xf32, #tpu.memory_space<vmem>>, vector<14x8xf32>
    tpu.vector_store %arg8[%c0_16, %c256], %14 {strides = array<i32>} : memref<16x384xf32, #tpu.memory_space<vmem>>, vector<14x8xf32>,
    %c0_17 = arith.constant 0 : index
    %c0_18 = arith.constant 0 : index
    %c0_19 = arith.constant 0 : index
    %16 = vector.load %arg4[%c0_17, %c0_18, %c0_19] : memref<1x8x8xf32, #tpu.memory_space<vmem>>, vector<1x2x8xf32>
    %17 = vector.shape_cast %16 : vector<1x2x8xf32> to vector<2x8xf32>
    %c14 = arith.constant 14 : index
    %c256_20 = arith.constant 256 : index
    %18 = vector.load %arg8[%c14, %c256_20] : memref<16x384xf32, #tpu.memory_space<vmem>>, vector<2x8xf32>
    tpu.vector_store %arg8[%c14, %c256_20], %17 {strides = array<i32>} : memref<16x384xf32, #tpu.memory_space<vmem>>, vector<2x8xf32>,
    %cst_21 = arith.constant 0.000000e+00 : f32
    %19 = vector.broadcast %cst_21 : f32 to vector<16x120xf32>
    %c0_22 = arith.constant 0 : index
    %c264 = arith.constant 264 : index
    %20 = vector.load %arg8[%c0_22, %c264] : memref<16x384xf32, #tpu.memory_space<vmem>>, vector<16x120xf32>
    tpu.vector_store %arg8[%c0_22, %c264], %19 {strides = array<i32>} : memref<16x384xf32, #tpu.memory_space<vmem>>, vector<16x120xf32>,
    %c0_23 = arith.constant 0 : index
    %c0_24 = arith.constant 0 : index
    %21 = vector.load %arg8[%c0_23, %c0_24] : memref<16x384xf32, #tpu.memory_space<vmem>>, vector<16x384xf32>
    %c0_25 = arith.constant 0 : index
    %c0_26 = arith.constant 0 : index
    %22 = vector.load %arg5[%c0_25, %c0_26] : memref<384x128xf32, #tpu.memory_space<vmem>>, vector<384x128xf32>
    %cst_27 = arith.constant dense<0.000000e+00> : vector<16x128xf32>
    %23 = tpu.matmul %21, %22, %cst_27 {dimension_numbers = #tpu.dot_dimension_numbers<[1], [0], [0], [1], [0, 0, 1, 1], [], []>} : vector<16x384xf32>, vector<384x128xf32>, vector<16x128xf32> -> vector<16x128xf32>
    %c0_28 = arith.constant 0 : index
    %c0_29 = arith.constant 0 : index
    %24 = vector.load %arg6[%c0_28, %c0_29] : memref<1x128xf32, #tpu.memory_space<vmem>>, vector<1x128xf32>
    %25 = vector.broadcast %24 : vector<1x128xf32> to vector<16x128xf32>
    %26 = arith.addf %23, %25 : vector<16x128xf32>
    %c0_30 = arith.constant 0 : index
    %c0_31 = arith.constant 0 : index
    %c0_32 = arith.constant 0 : index
    %27 = vector.load %arg7[%c0_30, %c0_31, %c0_32] : memref<1x16x128xf32, #tpu.memory_space<vmem>>, vector<1x16x128xf32>
    %28 = vector.shape_cast %27 : vector<1x16x128xf32> to vector<16x128xf32>
    %29 = vector.shape_cast %26 : vector<16x128xf32> to vector<1x16x128xf32>
    tpu.vector_store %arg7[%c0_30, %c0_31, %c0_32], %29 {strides = array<i32>} : memref<1x16x128xf32, #tpu.memory_space<vmem>>, vector<1x16x128xf32>,
    return
  }
  func.func @transform_0(%arg0: i32, %arg1: i32, %arg2: i32) -> (i32, i32, i32) {
    %c0_i32 = arith.constant 0 : i32
    %c0_i32_0 = arith.constant 0 : i32
    return %arg1, %arg2, %c0_i32 : i32, i32, i32
  }
  func.func @transform_1(%arg0: i32, %arg1: i32, %arg2: i32) -> (i32, i32, i32) {
    %c1_i32 = arith.constant 1 : i32
    %0 = arith.addi %arg2, %c1_i32 : i32
    %c2_i32 = arith.constant 2 : i32
    %1 = arith.muli %0, %c2_i32 : i32
    %c0_i32 = arith.constant 0 : i32
    %c0_i32_0 = arith.constant 0 : i32
    return %arg1, %1, %c0_i32 : i32, i32, i32
  }
  func.func @transform_2(%arg0: i32, %arg1: i32, %arg2: i32) -> (i32, i32) {
    %c0_i32 = arith.constant 0 : i32
    %c0_i32_0 = arith.constant 0 : i32
    return %c0_i32, %arg0 : i32, i32
  }
  func.func @transform_3(%arg0: i32, %arg1: i32, %arg2: i32) -> (i32, i32) {
    %c0_i32 = arith.constant 0 : i32
    %c0_i32_0 = arith.constant 0 : i32
    return %c0_i32, %arg0 : i32, i32
  }
  func.func @transform_4(%arg0: i32, %arg1: i32, %arg2: i32) -> (i32, i32, i32) {
    %c0_i32 = arith.constant 0 : i32
    return %arg1, %arg2, %arg0 : i32, i32, i32
  }
}

</mosaic_0001>

<bundles_post_ra>
// kernel: tpu_custom_call.1
= control target key start
LH: loop header
LB: loop body
LE: loop exit
PB: predicated region body
PF: predicated region fallthrough
CT: control target
= control target key end

     0   :  { %9 = vsyncpa [#allocation4], 0  ;;  %s1039_s0 = inlined_call_operand.vmem [shape: f32[2,24,8], index: 0, kind: input, shape index: {}]   ;;  %s1040_s1 = inlined_call_operand.vmem [shape: f32[2,24,8], index: 1, kind: input, shape index: {}]   ;;  %s1041_s2 = inlined_call_operand.hbm [shape: f32[384,128], index: 2, kind: input, shape index: {}]   ;;  %s1042_s3 = inlined_call_operand.vmem [shape: f32[1,128], index: 3, kind: input, shape index: {}]   ;;  %s1043_s4 = inlined_call_operand.hbm [shape: f32[2,16,128], index: 4, kind: output, shape index: {}]  }
   0x1   :  { %10 = vsyncpa [#allocation5], 0 }
   0x2   :  { %12 = vsyncpa [#allocation5 + $0x1], 0  ;;  %s900_s15 = smov 0   ;;  %s902_s16 = smov 0  }
   0x3   :  { %s904_s17 = smov 0   ;;  %s906_s18 = smov 0  }
   0x4   :  { %s908_s19 = smov 0   ;;  %s910_s20 = smov 0  }
   0x5 LB: > { %s645_s21 = sadd.s32 4294967295, %s867_s20   ;;  %s646_s22 = sadd.s32 4294967294, %s867_s20   ;;  %s867_s20 = sphi %s910_s20, %s18_s20   ;;  %s863_s19 = sphi %s908_s19, %s1050_s19   ;;  %s859_s18 = sphi %s906_s18, %s1049_s18   ;;  %s855_s17 = sphi %s904_s17, %s1048_s17   ;;  %s851_s16 = sphi %s902_s16, %s1047_s16   ;;  %s847_s15 = sphi %s900_s15, %s1046_s15  }
   0x6   : > { %s33_s23 = sadd.s32 1, %s863_s19  ;;  %s160_s24 = sadd.s32 1, %s855_s17 }
   0x7   : > { %p35_p0 = scmp.ge.s32.totalorder %s33_s23, 2  ;;  %p170_p1 = scmp.ne.s32.totalorder %s855_s17, %s851_s16 }
   0x8   : > { %p171_p2 = scmp.eq.s32.totalorder %s645_s21, 1  ;;  %p176_p3 = scmp.ne.s32.totalorder %s851_s16, %s847_s15 }
   0x9   : > { %s1052_s23 = smov (%p35_p0, %s33_s23), 0  ;;  %p177_p5 = scmp.eq.s32.totalorder %s646_s22, 1 }
   0xa   : > { %p940_p4 = por %p171_p2, %p170_p1  ;;  %s153_s26 = ssub.s32 %s863_s19, %s1052_s23 }
   0xb   : > { %p647_p6 = scmp.ge.s32.totalorder %s867_s20, 1  ;;  %p158_p7 = scmp.eq.s32.totalorder %s153_s26, 0 }
   0xc   : > { %p947_p8 = por %p177_p5, %p176_p3  ;;  %p184_p9 = scmp.lt.s32.totalorder %s867_s20, 3 }
   0xd   : > { %s953_s28 = scalar_select %p158_p7, %s855_s17, %s160_s24  }
   0xe   : > { %p185_p10 = pnand %p647_p6, %p184_p9  ;;  %p696_p11 = scmp.eq.s32.totalorder %s645_s21, 0 }
   0xf   : > { %s197_s5 = sshll.u32 %s1041_s2, 4  ;;  %s869_s6 = smov [#allocation3]   ;;  %s198_s5 = int_to_ptr.hbm [resolvable:$true] %s197_s5 }
  0x10   : > { %p688_p12 = pneg %p185_p10  ;;  %s199_s7 = sshll.u32 %s869_s6, 4  ;;  %s200_s7 = int_to_ptr.vmem [resolvable:$true] %s199_s7 }
  0x11   : > { %s870_s8 = smov 128   ;;  %s871_s9 = smov 8  }
  0x12   : > { %p689_p13 = pnand %p696_p11, %p688_p12  ;;  %257 = sbr.rel (%p185_p10) target bundleno = 202 (0xca), region = 36 }
  0x14   : > { %691 = dma.hbm_to_vmem [thread:$0]  (!%p689_p13), %s198_s5, 6144, %s200_s7, [#allocation4], %s870_s8, %s870_s8, %s871_s9  }
  0x17   : > { %838 = dma.done.wait (%p696_p11), [#allocation4], 6144  }
  0x18   : > { %840 = vsyncadd (%p696_p11), [#allocation4], 4294961152  ;;  %p310_p0 = scmp.lt.s32.totalorder %s859_s18, 1  ;;  %v423_v0 = vld [vmem:[#allocation3 + $0x178] sm:$0xff]  ;;  %v422_v2 = vld [vmem:[#allocation3 + $0x170] sm:$0xff]  ;;  %vm341_vm0 = vcmask 64512  }
  0x19   : > { %v391_v1 = vld [vmem:[#allocation3 + $0x78] sm:$0xff]  ;;  %474 = vmatpush.msra.mxu2 %v423_v0  ;;  %v390_v3 = vld [vmem:[#allocation3 + $0x70] sm:$0xff]  ;;  %v421_v5 = vld [vmem:[#allocation3 + $0x168] sm:$0xff]  ;;  %vm344_vm1 = vcmask 1047616   ;;  %v872_v32 = vmov 0.0   ;;  %vm360_vm2 = vcmask 62464  }
  0x1a   : > { %s960_s10 = scalar_select %p310_p0, %s859_s18, 1  ;;  %428 = vmatpush.msra.mxu0 %v391_v1  ;;  %v407_v4 = vld [vmem:[#allocation3 + $0xf8] sm:$0xff]  ;;  %664 = vmatpush.msra.mxu3 %v391_v1  ;;  %v389_v6 = vld [vmem:[#allocation3 + $0x68] sm:$0xff]  ;;  %v406_v7 = vld [vmem:[#allocation3 + $0xf0] sm:$0xff]  ;;  %vm366_vm3 = vcmask 64518   ;;  %vm350_vm4 = vcmask 63488  }
  0x1b   : > { %451 = vmatpush.msra.mxu1 %v407_v4  ;;  %475 = vmatpush.msra.mxu2 %v422_v2  ;;  %v405_v8 = vld [vmem:[#allocation3 + $0xe8] sm:$0xff]  ;;  %v420_v9 = vld [vmem:[#allocation3 + $0x160] sm:$0xff]  ;;  %v419_v12 = vld [vmem:[#allocation3 + $0x158] sm:$0xff]  ;;  %vm353_vm5 = vcmask 57344   ;;  %s302_s5 = sand.u32 1, %s851_s16   ;;  %s663_s7 = sshll.u32 %s859_s18, 4 }
  0x1c   : > { %429 = vmatpush.msra.mxu0 %v390_v3  ;;  %665 = vmatpush.msra.mxu3 %v390_v3  ;;  %v388_v10 = vld [vmem:[#allocation3 + $0x60] sm:$0xff]  ;;  %v387_v13 = vld [vmem:[#allocation3 + $0x58] sm:$0xff]  ;;  %v418_v15 = vld [vmem:[#allocation3 + $0x150] sm:$0xff]  ;;  %s680_s11 = smul.u32 24, %s960_s10  ;;  %s653_s6 = sshll.u32 %s302_s5, 4 }
  0x1d   : > { %452 = vmatpush.msra.mxu1 %v406_v7  ;;  %476 = vmatpush.msra.mxu2 %v421_v5  ;;  %v404_v11 = vld [vmem:[#allocation3 + $0xe0] sm:$0xff]  ;;  %v403_v14 = vld [vmem:[#allocation3 + $0xd8] sm:$0xff]  ;;  %v386_v16 = vld [vmem:[#allocation3 + $0x50] sm:$0xff]  ;;  %s514_s10 = scalar_lea.hbm %s1043_s4, %s663_s7  ;;  %s500_s18 = scalar_lea.sflag [#allocation5], %s302_s5 }
  0x1e   : > { %430 = vmatpush.msra.mxu0 %v389_v6  ;;  %666 = vmatpush.msra.mxu3 %v389_v6  ;;  %v402_v17 = vld [vmem:[#allocation3 + $0xd0] sm:$0xff]  ;;  %v417_v18 = vld [vmem:[#allocation3 + $0x148] sm:$0xff]  ;;  %v416_v21 = vld [vmem:[#allocation3 + $0x140] sm:$0xff]  ;;  %s966_s14 = scalar_lea.vmem %s1039_s0, %s680_s11  ;;  %s662_s21 = sadd.s32 16, %s680_s11 }
  0x1f   : > { %453 = vmatpush.msra.mxu1 %v405_v8  ;;  %477 = vmatpush.msra.mxu2 %v420_v9  ;;  %v385_v19 = vld [vmem:[#allocation3 + $0x48] sm:$0xff]  ;;  %v384_v22 = vld [vmem:[#allocation3 + $0x40] sm:$0xff]  ;;  %v415_v24 = vld [vmem:[#allocation3 + $0x138] sm:$0xff]  ;;  %s972_s26 = scalar_lea.vmem %s1040_s1, %s662_s21  ;;  %s304_s11 = scalar_lea.vmem [#allocation6], %s653_s6 }
  0x20   : > { %431 = vmatpush.msra.mxu0 %v388_v10  ;;  %667 = vmatpush.msra.mxu3 %v388_v10  ;;  %v401_v20 = vld [vmem:[#allocation3 + $0xc8] sm:$0xff]  ;;  %v400_v23 = vld [vmem:[#allocation3 + $0xc0] sm:$0xff]  ;;  %v383_v25 = vld [vmem:[#allocation3 + $0x38] sm:$0xff]  ;;  %s515_s12 = sshll.u32 %s304_s11, 4  ;;  %s517_s13 = sshll.u32 %s514_s10, 4  ;;  %s516_s12 = int_to_ptr.vmem [resolvable:$true] %s515_s12  ;;  %s518_s13 = int_to_ptr.hbm [resolvable:$true] %s517_s13 }
  0x21   : > { %454 = vmatpush.msra.mxu1 %v404_v11  ;;  %478 = vmatpush.msra.mxu2 %v419_v12  ;;  %v399_v26 = vld [vmem:[#allocation3 + $0xb8] sm:$0xff]  ;;  %v414_v28 = vld [vmem:[#allocation3 + $0x130] sm:$0xff]  ;;  %v413_v34 = vld [vmem:[#allocation3 + $0x128] sm:$0xff] }
  0x22   : > { %432 = vmatpush.msra.mxu0 %v387_v13  ;;  %668 = vmatpush.msra.mxu3 %v387_v13  ;;  %v357_v27 = vld [vmem:[%s966_s14 + $0x2] sm:$0xff]  ;;  %v381_v35 = vld [vmem:[#allocation3 + $0x28] sm:$0xff]  ;;  %v362_v36 = vld [vmem:[%s972_s26] sm:$0x3] }
  0x23   : > { %455 = vmatpush.msra.mxu1 %v403_v14  ;;  %479 = vmatpush.msra.mxu2 %v418_v15  ;;  %v382_v29 = vld [vmem:[#allocation3 + $0x30] sm:$0xff]  ;;  %359 = vst.msk [vmem:[#allocation2 + $0x10] sm:$0xff] %vm341_vm0, %v357_v27  ;;  %v340_v33 = vld [vmem:[%s966_s14 + $0x8] sm:$0xff]  ;;  %v397_v37 = vld [vmem:[#allocation3 + $0xa8] sm:$0xff]  ;;  %v364_v43 = vrot.slane %v362_v36, 2 }
  0x24   : > { %433 = vmatpush.msra.mxu0 %v386_v16  ;;  %669 = vmatpush.msra.mxu3 %v386_v16  ;;  %v339_v30 = vld [vmem:[%s966_s14] sm:$0xff]  ;;  %368 = vst.msk [vmem:[#allocation2 + $0x10] sm:$0xff] %vm344_vm1, %v872_v32  ;;  %v412_v39 = vld [vmem:[#allocation3 + $0x120] sm:$0xff]  ;;  %v358_v42 = vld [vmem:[%s966_s14 + $0xa] sm:$0x3f] }
  0x25   : > { %456 = vmatpush.msra.mxu1 %v402_v17  ;;  %480 = vmatpush.msra.mxu2 %v417_v18  ;;  %v398_v31 = vld [vmem:[#allocation3 + $0xb0] sm:$0xff]  ;;  %342 = vst.msk [vmem:[#allocation2] sm:$0xff] %vm341_vm0, %v339_v30  ;;  %v380_v40 = vld [vmem:[#allocation3 + $0x20] sm:$0xff]  ;;  %v411_v44 = vld [vmem:[#allocation3 + $0x118] sm:$0xff] }
  0x26   : > { %434 = vmatpush.msra.mxu0 %v385_v19  ;;  %670 = vmatpush.msra.mxu3 %v385_v19  ;;  %345 = vst.msk [vmem:[#allocation2] sm:$0xff] %vm344_vm1, %v872_v32  ;;  %v347_v38 = vld [vmem:[%s966_s14 + $0x1] sm:$0xff]  ;;  %v396_v41 = vld [vmem:[#allocation3 + $0xa0] sm:$0xff]  ;;  %v348_v49 = vld [vmem:[%s966_s14 + $0x9] sm:$0x7f]  ;;  %s799_s14 = sshra.s32 %s518_s13, 4  ;;  %s800_s14 = int_to_ptr.hbm [resolvable:$true] %s799_s14 }
  0x27   : > { %457 = vmatpush.msra.mxu1 %v401_v20  ;;  %481 = vmatpush.msra.mxu2 %v416_v21  ;;  %343 = vst.msk [vmem:[#allocation2 + $0x18] sm:$0xff] %vm341_vm0, %v340_v33  ;;  %v379_v45 = vld [vmem:[#allocation3 + $0x18] sm:$0xff]  ;;  %v410_v47 = vld [vmem:[#allocation3 + $0x110] sm:$0xff]  ;;  %v409_v52 = vld [vmem:[#allocation3 + $0x108] sm:$0xff]  ;;  %s801_s21 = scalar_lea.hbm %s800_s14, 16  ;;  %p806_p5 = scmp.lt.s32.totalorder %s800_s14, %s1043_s4 }
  0x28   : > { %435 = vmatpush.msra.mxu0 %v384_v22  ;;  %671 = vmatpush.msra.mxu3 %v384_v22  ;;  %346 = vst.msk [vmem:[#allocation2 + $0x18] sm:$0xff] %vm344_vm1, %v872_v32  ;;  %v395_v46 = vld [vmem:[#allocation3 + $0x98] sm:$0xff]  ;;  %v378_v48 = vld [vmem:[#allocation3 + $0x10] sm:$0xff]  ;;  %v377_v53 = vld [vmem:[#allocation3 + $0x8] sm:$0xff]  ;;  %p802_p1 = scmp.ne.s32.totalorder %s800_s14, %s801_s21 }
  0x29   : > { %458 = vmatpush.msra.mxu1 %v400_v23  ;;  %482 = vmatpush.msra.mxu2 %v415_v24  ;;  %349 = vst.msk [vmem:[#allocation2 + $0x8] sm:$0xff] %vm341_vm0, %v347_v38  ;;  %v394_v50 = vld [vmem:[#allocation3 + $0x90] sm:$0xff]  ;;  %v393_v54 = vld [vmem:[#allocation3 + $0x88] sm:$0xff]  ;;  %v408_v55 = vld [vmem:[#allocation3 + $0x100] sm:$0xff] }
  0x2a   : > { %436 = vmatpush.msra.mxu0 %v383_v25  ;;  %672 = vmatpush.msra.mxu3 %v383_v25  ;;  %355 = vst.msk [vmem:[#allocation2 + $0x8] sm:$0xff] %vm344_vm1, %v872_v32  ;;  %v352_v51 = vld [vmem:[%s972_s26] sm:$0x1]  ;;  %v376_v56 = vld [vmem:[#allocation3] sm:$0xff]  ;;  %p803_p2 = pnand %p802_p1, %p940_p4  ;;  %s805_s26 = scalar_lea.hbm %s1043_s4, 32 }
  0x2b   : > { %459 = vmatpush.msra.mxu1 %v399_v26  ;;  %483 = vmatpush.msra.mxu2 %v414_v28  ;;  %361 = vst.msk [vmem:[#allocation2 + $0x28] sm:$0x3f] %vm360_vm2, %v358_v42  ;;  %v372_v57 = vld [vmem:[#allocation2 + $0x10] sm:$0xff]  ;;  %v754_v0 = vld [vmem:[%s1042_s3] ss:$0 sm:$0xff]  ;;  %p807_p6 = scmp.lt.s32.totalorder %s805_s26, %s801_s21 }
  0x2c   : > { %437 = vmatpush.msra.mxu0 %v382_v29  ;;  %673 = vmatpush.msra.mxu3 %v382_v29  ;;  %367 = vst.msk [vmem:[#allocation2 + $0x28] sm:$0xc0] %vm366_vm3, %v364_v43  ;;  %v392_v59 = vld [vmem:[#allocation3 + $0x80] sm:$0xff]  ;;  %p804_p3 = pneg %p803_p2 }
  0x2d   : > { %460 = vmatpush.msra.mxu1 %v398_v31  ;;  %484 = vmatpush.msra.mxu2 %v413_v34  ;;  %369 = vst.msk [vmem:[#allocation2 + $0x28] sm:$0xff] %vm344_vm1, %v872_v32  ;;  %v370_v58 = vld [vmem:[#allocation2] sm:$0xff]  ;;  %p808_p7 = por %p807_p6, %p806_p5 }
  0x2e   : > { %438 = vmatpush.msra.mxu0 %v381_v35  ;;  %674 = vmatpush.msra.mxu3 %v381_v35  ;;  %351 = vst.msk [vmem:[#allocation2 + $0x20] sm:$0x7f] %vm350_vm4, %v348_v49 }
  0x2f   : > { %461 = vmatpush.msra.mxu1 %v397_v37  ;;  %485 = vmatpush.msra.mxu2 %v412_v39  ;;  %354 = vst.msk [vmem:[#allocation2 + $0x27] sm:$0x1] %vm353_vm5, %v352_v51  ;;  %v373_v60 = vld [vmem:[#allocation2 + $0x18] sm:$0xff]  ;;  %p809_p9 = pnand %p808_p7, %p804_p3 }
  0x30   : > { %439 = vmatpush.msra.mxu0 %v380_v40  ;;  %675 = vmatpush.msra.mxu3 %v380_v40  ;;  %356 = vst.msk [vmem:[#allocation2 + $0x20] sm:$0xff] %vm344_vm1, %v872_v32 }
  0x31   : > { %462 = vmatpush.msra.mxu1 %v396_v41  ;;  %486 = vmatpush.msra.mxu2 %v411_v44  ;;  %v371_v61 = vld [vmem:[#allocation2 + $0x8] sm:$0xff] }
  0x32   : > { %440 = vmatpush.msra.mxu0 %v379_v45  ;;  %676 = vmatpush.msra.mxu3 %v379_v45 }
  0x33   : > { %463 = vmatpush.msra.mxu1 %v395_v46  ;;  %487 = vmatpush.msra.mxu2 %v410_v47 }
  0x34   : > { %441 = vmatpush.msra.mxu0 %v378_v48  ;;  %677 = vmatpush.msra.mxu3 %v378_v48  ;;  %v375_v62 = vld [vmem:[#allocation2 + $0x28] sm:$0xff] }
  0x35   : > { %464 = vmatpush.msra.mxu1 %v394_v50  ;;  %488 = vmatpush.msra.mxu2 %v409_v52 }
  0x36   : > { %442 = vmatpush.msra.mxu0 %v377_v53  ;;  %678 = vmatpush.msra.mxu3 %v377_v53 }
  0x37   : > { %465 = vmatpush.msra.mxu1 %v393_v54  ;;  %489 = vmatpush.msra.mxu2 %v408_v55  ;;  %v374_v63 = vld [vmem:[#allocation2 + $0x20] sm:$0xff] }
  0x38   : > { %443 = vmatpush.msra.mxu0 %v376_v56  ;;  %490 = vmatmul.f32.vlgmr.msra.gmra.mxu2 %v372_v57 }
  0x39   : > { %444 = vmatmul.f32.vlgmr.msra.gmra.mxu0 %v370_v58  ;;  %679 = vmatpush.msra.mxu3 %v376_v56 }
  0x3a   : > { %466 = vmatpush.msra.mxu1 %v392_v59  ;;  %447 = vmatmul.f32.vlgmr.msra.gmra.mxu3 %v373_v60 }
  0x3b   : > { %467 = vmatmul.f32.vlgmr.msra.gmra.mxu1 %v371_v61 }
  0x40   : > { %493 = vmatmul.f32.gmra.mxu2 %v375_v62 }
  0x43   : > { %470 = vmatmul.f32.gmra.mxu1 %v374_v63 }
  0xb6   : > { %v445_v1 = vpop.f32.mrf.mxu0 }
  0xb7   : > { %v446_v2 = vadd.f32 %v754_v0, %v445_v1 }
  0xb8   : > { %v468_v3 = vpop.f32.mrf.mxu1 }
  0xb9   : > { %v469_v4 = vadd.f32 %v468_v3, %v446_v2 }
  0xbb   : > { %v491_v5 = vpop.f32.mrf.mxu2 }
  0xbc   : > { %v492_v6 = vadd.f32 %v491_v5, %v469_v4 }
  0xbd   : > { %v448_v7 = vpop.f32.mrf.mxu3 }
  0xbe   : > { %497 = vst [vmem:[%s304_s11] sm:$0xff] %v492_v6  ;;  %v449_v8 = vadd.f32 %v754_v0, %v448_v7 }
  0xc0   : > { %v471_v9 = vpop.f32.mrf.mxu1 }
  0xc1   : > { %v472_v10 = vadd.f32 %v471_v9, %v449_v8 }
  0xc3   : > { %v494_v11 = vpop.f32.mrf.mxu2 }
  0xc4   : > { %v495_v12 = vadd.f32 %v494_v11, %v472_v10 }
  0xc6   : > { %498 = vst [vmem:[%s304_s11 + $0x8] sm:$0xff] %v495_v12 }
  0xc7   : > { %812 = shalt.err (!%p809_p9)
}
  0xc8   : > { %s873_s5 = smov 128   ;;  %s874_s6 = smov 8  }
  0xc9   : > { %686 = dma.vmem_to_hbm [thread:$0]  (%p940_p4), %s516_s12, 256, %s518_s13, %s500_s18, %s873_s5, %s873_s5, %s874_s6  }
  0xca PF: > { %p699_p10 = scmp.ge.s32.totalorder %s867_s20, 2  ;;  %s532_s7 = sand.u32 1, %s847_s15  }
  0xcb   : > { %s533_s8 = scalar_lea.sflag [#allocation5], %s532_s7 }
  0xcc   : > { %p693_p11 = pnand %p699_p10, %p947_p8 }
  0xce   : > { %p694_p12 = pneg %p693_p11 }
  0xd0   : > { %842 = dma.done.wait (%p694_p12), %s533_s8, 256  }
  0xd1   : > { %844 = vsyncadd (%p694_p12), %s533_s8, 4294967040  ;;  %s18_s20 = sadd.s32 1, %s867_s20   ;;  %s1046_s15 = smov %s851_s16 }
  0xd2   : > { %p15_p13 = scmp.ge.s32.totalorder %s18_s20, 4   ;;  %s1047_s16 = smov %s855_s17 }
  0xd3   : > { %s1048_s17 = smov %s953_s28  ;;  %s1049_s18 = smov %s863_s19 }
  0xd4   : > { %s1050_s19 = smov %s1052_s23  ;;  %17 = sbr.rel (!%p15_p13) target bundleno = 5 (0x5), region = 83 }
  0xd9   :  { %539 = vsyncpa [#allocation4], 1 }
  0xda   :  { %541 = vsyncpa [#allocation4 + $0x1], 1 }
  0xdb   :  { %542 = vsyncpa [#allocation5], 1 }
  0xdc   :  { %544 = vsyncpa [#allocation5 + $0x1], 1 }

</bundles_post_ra>
